<compile_context>
chip_gen: v7x
topology: tpu7x:2x2x1
jax: 0.10.0
libtpu: 0.0.40
codegen_flags: <defaults>
</compile_context>

<pallas_src>
import math
import numpy as np
import jax
import jax.numpy as jnp
from jax.experimental import pallas as pl
from jax.experimental.pallas import tpu as pltpu

# ---------------- model hyper-params (small, consistent with the module) ----------------
L = 8             # sequence length
N = 2             # batch
E = 32            # d_model
H = 4             # nhead
DH = E // H       # head dim
F = 64            # dim_feedforward
EPS = 1e-5
NL = N * L        # fused row count; row index = l*N + n (native (L, N, E) row order)

# Packed bf16 weight slab: rows = input features, columns = concatenated matrices.
_QK0, _QK1 = 0, 2 * E                      # [WqT*scale | WkT] : (E, 2E)
_V0,  _V1  = _QK1, _QK1 + E                # WvT               : (E, E)
_O0,  _O1  = _V1,  _V1 + E                 # WoT               : (E, E)
_F10, _F11 = _O1,  _O1 + F                 # W1T               : (E, F)
_F20, _F21 = _F11, _F11 + E                # W2T               : (F, E)
W_ROWS, W_COLS = F, _F21                   # (64, 224)

_MASK_VAL = -1e30                          # additive mask for cross-batch score entries


def _layernorm(y, gamma, beta):
    mu = jnp.mean(y, axis=-1, keepdims=True)
    var = jnp.mean((y - mu) ** 2, axis=-1, keepdims=True)
    return (y - mu) * jax.lax.rsqrt(var + EPS) * gamma + beta


def encoder_layer_kernel(x_ref, pos_ref, w_ref, aux_ref, out_ref):
    # Rows keep the native (seq, batch)-interleaved order (row = l*N + n).  Everything except
    # attention is row-wise; attention handles batching with a static block-diagonal mask.
    x = x_ref[...]                          # (NL, E) f32
    pe = pos_ref[...]

    # packed bias / LayerNorm vectors (f32)
    bqk = aux_ref[0:1, 0:2 * E]             # [bq*scale | bk]
    b1  = aux_ref[1:2, 0:F]
    bv  = aux_ref[2:3, 0:E]
    bo  = aux_ref[2:3, E:2 * E]
    b2  = aux_ref[3:4, 0:E]
    g1  = aux_ref[4:5, 0:E]
    be1 = aux_ref[4:5, E:2 * E]
    g2  = aux_ref[5:6, 0:E]
    be2 = aux_ref[5:6, E:2 * E]

    # ---- in-projections: fused Q|K matmul on (src+pos), V on src (bf16 MXU, f32 accum) ----
    qk_in = (x + pe).astype(jnp.bfloat16)   # q = k = src + pos ; v uses src
    x_b = x.astype(jnp.bfloat16)
    qk = jnp.dot(qk_in, w_ref[0:E, _QK0:_QK1], preferred_element_type=jnp.float32) + bqk
    v  = jnp.dot(x_b,   w_ref[0:E, _V0:_V1],   preferred_element_type=jnp.float32) + bv

    q = qk[:, :E]          # 1/sqrt(DH) pre-folded into Wq / bq at prepare_params time
    k = qk[:, E:]

    # ---- head-batched attention: ONE score einsum, ONE softmax, ONE PV einsum -------------
    def to_heads(t):       # (NL, E) -> (H, NL, DH), bf16
        t = t.astype(jnp.bfloat16)
        return jnp.concatenate(
            [t[:, h * DH:(h + 1) * DH] for h in range(H)], axis=0).reshape(H, NL, DH)

    qh, kh, vh = to_heads(q), to_heads(k), to_heads(v)
    s = jnp.einsum('hld,hmd->hlm', qh, kh, preferred_element_type=jnp.float32)  # (H, NL, NL)

    # block-diagonal mask: row l*N+n only attends to columns m*N+n (same batch element)
    ri = jax.lax.broadcasted_iota(jnp.int32, (NL, NL), 0)
    ci = jax.lax.broadcasted_iota(jnp.int32, (NL, NL), 1)
    s = jnp.where((ri % N) == (ci % N), s, jnp.float32(_MASK_VAL))

    s = s - jnp.max(s, axis=-1, keepdims=True)
    p = jnp.exp(s)
    p = p / jnp.sum(p, axis=-1, keepdims=True)       # exact divide, softmax kept in f32
    o = jnp.einsum('hlm,hmd->hld', p.astype(jnp.bfloat16), vh,
                   preferred_element_type=jnp.float32)                          # (H, NL, DH)

    # ---- heads re-concatenated in lanes -> ONE K=E output-projection matmul ---------------
    o2 = o.reshape(H * NL, DH)
    o_cat = jnp.concatenate([o2[h * NL:(h + 1) * NL, :] for h in range(H)], axis=1)  # (NL, E)
    attn = jnp.dot(o_cat.astype(jnp.bfloat16), w_ref[0:E, _O0:_O1],
                   preferred_element_type=jnp.float32) + bo

    # ---- residual + norm1 (dropout1 = identity in eval) -----------------------------------
    y = _layernorm(x + attn, g1, be1)

    # ---- FFN: linear2(relu(linear1(y))) (dropout = identity in eval) ----------------------
    hdn = jnp.maximum(
        jnp.dot(y.astype(jnp.bfloat16), w_ref[0:E, _F10:_F11],
                preferred_element_type=jnp.float32) + b1, 0.0)
    ffn = jnp.dot(hdn.astype(jnp.bfloat16), w_ref[0:F, _F20:_F21],
                  preferred_element_type=jnp.float32) + b2

    # ---- residual + norm2, one lane-dense slab store ---------------------------------------
    out_ref[...] = _layernorm(y + ffn, g2, be2)


def prepare_params(params):
    """One-time parameter packing (runs at parameter-load time, NOT on the per-call path)."""
    (wq, wk, wv, bq, bk, bv, wo, bo, w1, b1, w2, b2, g1, be1, g2, be2) = params
    scale = 1.0 / math.sqrt(DH)

    # bf16 weight slab: [WqT*scale | WkT | WvT | WoT | W1T | W2T], rows = input features.
    top = jnp.concatenate([(wq * scale).T, wk.T, wv.T, wo.T, w1.T], axis=1)   # (E, 4E+F)
    top = jnp.pad(top, ((0, W_ROWS - E), (0, 0)))                             # (F, 4E+F)
    wpack = jnp.concatenate([top, w2.T], axis=1).astype(jnp.bfloat16)         # (F, W_COLS)

    def row(*vecs):
        r = jnp.concatenate(vecs, axis=1)
        return jnp.pad(r, ((0, 0), (0, 128 - r.shape[1])))

    aux = jnp.concatenate([
        row(bq * scale, bk),        # row 0: [bq*scale | bk]
        row(b1),                    # row 1: b1
        row(bv, bo),                # row 2: [bv | bo]
        row(b2),                    # row 3: b2
        row(g1, be1),               # row 4: [gamma1 | beta1]
        row(g2, be2),               # row 5: [gamma2 | beta2]
        jnp.zeros((2, 128), jnp.float32),
    ], axis=0).astype(jnp.float32)                                            # (8, 128)

    return wpack, aux


_COST = pl.CostEstimate(
    flops=(2 * NL * E * (2 * E)      # fused Q|K projection
           + 2 * NL * E * E          # V projection
           + 2 * H * NL * NL * DH    # scores
           + 2 * H * NL * NL * DH    # P @ V
           + 2 * NL * E * E          # output projection
           + 2 * NL * E * F          # FFN linear1
           + 2 * NL * F * E),        # FFN linear2
    transcendentals=H * NL * NL + 2 * NL,
    bytes_accessed=2 * NL * E * 4 + W_ROWS * W_COLS * 2 + 8 * 128 * 4 + NL * E * 4,
)

_VMEM = pl.BlockSpec(memory_space=pltpu.MemorySpace.VMEM)


# NOTE(perf): single grid-free invocation -- the whole problem is ~40 KB of VMEM-resident data.
# If L/N/E are scaled up, add a grid over the fused row dimension with
# dimension_semantics=("parallel",) (shards across both TensorCores on v7x) and size the row
# tile for v7x's 64 MiB VMEM; stacking several layers per call would amortize per-call
# overhead further.
@jax.jit
def transformer_encoder_layer(src, pos, wpack, aux):
    """src, pos: (L, N, E) float32 (native layout); wpack/aux from prepare_params()."""
    x2 = src.reshape(NL, E)      # contiguous reshape: bitcast-level, no transpose / HBM copy
    p2 = pos.reshape(NL, E)
    out = pl.pallas_call(
        encoder_layer_kernel,
        out_shape=jax.ShapeDtypeStruct((NL, E), jnp.float32),
        in_specs=[_VMEM, _VMEM, _VMEM, _VMEM],
        out_specs=_VMEM,
        cost_estimate=_COST,
    )(x2, p2, wpack, aux)
    return out.reshape(L, N, E)  # contiguous reshape back to the module's (L, N, E) layout


def reference(src, pos, params):
    """Pure-JAX reference replicating PyTorch forward_post (eval mode)."""
    (wq, wk, wv, bq, bk, bv, wo, bo, w1, b1, w2, b2, g1, be1, g2, be2) = params
    x = jnp.transpose(src, (1, 0, 2))       # (N, L, E)
    p = jnp.transpose(pos, (1, 0, 2))
    qk = x + p
    q = qk @ wq.T + bq
    k = qk @ wk.T + bk
    v = x @ wv.T + bv

    def split(t):  # (N, L, E) -> (N, H, L, DH)
        return jnp.transpose(t.reshape(N, L, H, DH), (0, 2, 1, 3))
    qh, kh, vh = split(q), split(k), split(v)
    s = jnp.einsum('nhld,nhmd->nhlm', qh * (1.0 / math.sqrt(DH)), kh)
    a = jax.nn.softmax(s, axis=-1)
    o = jnp.einsum('nhlm,nhmd->nhld', a, vh)
    o = jnp.transpose(o, (0, 2, 1, 3)).reshape(N, L, E)
    o = o @ wo.T + bo

    y = _layernorm(x + o, g1, be1)
    f = jnp.maximum(y @ w1.T + b1, 0.0) @ w2.T + b2
    z = _layernorm(y + f, g2, be2)
    return jnp.transpose(z, (1, 0, 2))


if __name__ == "__main__":
    key = jax.random.PRNGKey(0)
    ks = jax.random.split(key, 12)

    src = jax.random.normal(ks[0], (L, N, E), jnp.float32)
    pos = jax.random.normal(ks[1], (L, N, E), jnp.float32) * 0.1

    # Deterministic synthetic parameter init (shapes from the module's __init__).
    wq = jax.random.normal(ks[2], (E, E), jnp.float32) * 0.05
    wk = jax.random.normal(ks[3], (E, E), jnp.float32) * 0.05
    wv = jax.random.normal(ks[4], (E, E), jnp.float32) * 0.05
    bq = jax.random.normal(ks[5], (1, E), jnp.float32) * 0.01
    bk = jax.random.normal(ks[6], (1, E), jnp.float32) * 0.01
    bv = jnp.zeros((1, E), jnp.float32)
    wo = jax.random.normal(ks[7], (E, E), jnp.float32) * 0.05
    bo = jnp.zeros((1, E), jnp.float32)
    w1 = jax.random.normal(ks[8], (F, E), jnp.float32) * 0.05
    b1 = jax.random.normal(ks[9], (1, F), jnp.float32) * 0.01
    w2 = jax.random.normal(ks[10], (E, F), jnp.float32) * 0.05
    b2 = jax.random.normal(ks[11], (1, E), jnp.float32) * 0.01
    g1, be1 = jnp.ones((1, E), jnp.float32), jnp.zeros((1, E), jnp.float32)
    g2, be2 = jnp.ones((1, E), jnp.float32), jnp.zeros((1, E), jnp.float32)

    params = (wq, wk, wv, bq, bk, bv, wo, bo, w1, b1, w2, b2, g1, be1, g2, be2)

    # One-time weight / bias packing (off the per-call path).
    wpack, aux = prepare_params(params)
    wpack, aux = jax.block_until_ready((wpack, aux))

    out = transformer_encoder_layer(src, pos, wpack, aux)
    out = jax.block_until_ready(out)

    ref = jax.block_until_ready(reference(src, pos, params))
    # Tolerance accounts for bf16 MXU operands (accumulation, softmax and LayerNorm are f32).
    np.testing.assert_allclose(np.asarray(out), np.asarray(ref), atol=1e-2, rtol=1e-2)

    print("KERNEL_OK")
</pallas_src>

<mosaic_0001>
module attributes {stable_mosaic.version = 11 : i64} {
  func.func @encoder_layer_kernel(%arg0: memref<16x32xf32, #tpu.memory_space<vmem>>, %arg1: memref<16x32xf32, #tpu.memory_space<vmem>>, %arg2: memref<64x224xbf16, #tpu.memory_space<vmem>>, %arg3: memref<8x128xf32, #tpu.memory_space<vmem>>, %arg4: memref<16x32xf32, #tpu.memory_space<vmem>>) attributes {dimension_semantics = [], scalar_prefetch = 0 : i64, scratch_operands = 0 : i64, tpu.core_type = #tpu.core_type<tc>} {
    %c0 = arith.constant 0 : index
    %c0_0 = arith.constant 0 : index
    %0 = vector.load %arg0[%c0, %c0_0] : memref<16x32xf32, #tpu.memory_space<vmem>>, vector<16x32xf32>
    %c0_1 = arith.constant 0 : index
    %c0_2 = arith.constant 0 : index
    %1 = vector.load %arg1[%c0_1, %c0_2] : memref<16x32xf32, #tpu.memory_space<vmem>>, vector<16x32xf32>
    %c0_3 = arith.constant 0 : index
    %c0_4 = arith.constant 0 : index
    %2 = vector.load %arg3[%c0_3, %c0_4] : memref<8x128xf32, #tpu.memory_space<vmem>>, vector<1x64xf32>
    %c1 = arith.constant 1 : index
    %c0_5 = arith.constant 0 : index
    %3 = vector.load %arg3[%c1, %c0_5] : memref<8x128xf32, #tpu.memory_space<vmem>>, vector<1x64xf32>
    %c2 = arith.constant 2 : index
    %c0_6 = arith.constant 0 : index
    %4 = vector.load %arg3[%c2, %c0_6] : memref<8x128xf32, #tpu.memory_space<vmem>>, vector<1x32xf32>
    %c2_7 = arith.constant 2 : index
    %c32 = arith.constant 32 : index
    %5 = vector.load %arg3[%c2_7, %c32] : memref<8x128xf32, #tpu.memory_space<vmem>>, vector<1x32xf32>
    %c3 = arith.constant 3 : index
    %c0_8 = arith.constant 0 : index
    %6 = vector.load %arg3[%c3, %c0_8] : memref<8x128xf32, #tpu.memory_space<vmem>>, vector<1x32xf32>
    %c4 = arith.constant 4 : index
    %c0_9 = arith.constant 0 : index
    %7 = vector.load %arg3[%c4, %c0_9] : memref<8x128xf32, #tpu.memory_space<vmem>>, vector<1x32xf32>
    %c4_10 = arith.constant 4 : index
    %c32_11 = arith.constant 32 : index
    %8 = vector.load %arg3[%c4_10, %c32_11] : memref<8x128xf32, #tpu.memory_space<vmem>>, vector<1x32xf32>
    %c5 = arith.constant 5 : index
    %c0_12 = arith.constant 0 : index
    %9 = vector.load %arg3[%c5, %c0_12] : memref<8x128xf32, #tpu.memory_space<vmem>>, vector<1x32xf32>
    %c5_13 = arith.constant 5 : index
    %c32_14 = arith.constant 32 : index
    %10 = vector.load %arg3[%c5_13, %c32_14] : memref<8x128xf32, #tpu.memory_space<vmem>>, vector<1x32xf32>
    %11 = arith.addf %0, %1 : vector<16x32xf32>
    %12 = arith.truncf %11 : vector<16x32xf32> to vector<16x32xbf16>
    %13 = arith.truncf %0 : vector<16x32xf32> to vector<16x32xbf16>
    %c0_15 = arith.constant 0 : index
    %c0_16 = arith.constant 0 : index
    %14 = vector.load %arg2[%c0_15, %c0_16] : memref<64x224xbf16, #tpu.memory_space<vmem>>, vector<32x64xbf16>
    %cst = arith.constant dense<0.000000e+00> : vector<16x64xf32>
    %15 = tpu.matmul %12, %14, %cst {dimension_numbers = #tpu.dot_dimension_numbers<[1], [0], [0], [1], [0, 0, 1, 1], [], []>} : vector<16x32xbf16>, vector<32x64xbf16>, vector<16x64xf32> -> vector<16x64xf32>
    %16 = vector.broadcast %2 : vector<1x64xf32> to vector<16x64xf32>
    %17 = arith.addf %15, %16 : vector<16x64xf32>
    %c0_17 = arith.constant 0 : index
    %c64 = arith.constant 64 : index
    %18 = vector.load %arg2[%c0_17, %c64] : memref<64x224xbf16, #tpu.memory_space<vmem>>, vector<32x32xbf16>
    %cst_18 = arith.constant dense<0.000000e+00> : vector<16x32xf32>
    %19 = tpu.matmul %13, %18, %cst_18 {dimension_numbers = #tpu.dot_dimension_numbers<[1], [0], [0], [1], [0, 0, 1, 1], [], []>} : vector<16x32xbf16>, vector<32x32xbf16>, vector<16x32xf32> -> vector<16x32xf32>
    %20 = vector.broadcast %4 : vector<1x32xf32> to vector<16x32xf32>
    %21 = arith.addf %19, %20 : vector<16x32xf32>
    %22 = vector.extract_strided_slice %17 {offsets = [0, 0], sizes = [16, 32], strides = [1, 1]} : vector<16x64xf32> to vector<16x32xf32>
    %23 = vector.extract_strided_slice %17 {offsets = [0, 32], sizes = [16, 32], strides = [1, 1]} : vector<16x64xf32> to vector<16x32xf32>
    %24 = arith.truncf %22 : vector<16x32xf32> to vector<16x32xbf16>
    %25 = vector.extract_strided_slice %24 {offsets = [0, 0], sizes = [16, 8], strides = [1, 1]} : vector<16x32xbf16> to vector<16x8xbf16>
    %26 = vector.extract_strided_slice %24 {offsets = [0, 8], sizes = [16, 8], strides = [1, 1]} : vector<16x32xbf16> to vector<16x8xbf16>
    %27 = vector.extract_strided_slice %24 {offsets = [0, 16], sizes = [16, 8], strides = [1, 1]} : vector<16x32xbf16> to vector<16x8xbf16>
    %28 = vector.extract_strided_slice %24 {offsets = [0, 24], sizes = [16, 8], strides = [1, 1]} : vector<16x32xbf16> to vector<16x8xbf16>
    %29 = tpu.concatenate %25, %26, %27, %28 in 0 : vector<16x8xbf16>, vector<16x8xbf16>, vector<16x8xbf16>, vector<16x8xbf16> -> vector<64x8xbf16>
    %30 = vector.shape_cast %29 : vector<64x8xbf16> to vector<4x16x8xbf16>
    %31 = arith.truncf %23 : vector<16x32xf32> to vector<16x32xbf16>
    %32 = vector.extract_strided_slice %31 {offsets = [0, 0], sizes = [16, 8], strides = [1, 1]} : vector<16x32xbf16> to vector<16x8xbf16>
    %33 = vector.extract_strided_slice %31 {offsets = [0, 8], sizes = [16, 8], strides = [1, 1]} : vector<16x32xbf16> to vector<16x8xbf16>
    %34 = vector.extract_strided_slice %31 {offsets = [0, 16], sizes = [16, 8], strides = [1, 1]} : vector<16x32xbf16> to vector<16x8xbf16>
    %35 = vector.extract_strided_slice %31 {offsets = [0, 24], sizes = [16, 8], strides = [1, 1]} : vector<16x32xbf16> to vector<16x8xbf16>
    %36 = tpu.concatenate %32, %33, %34, %35 in 0 : vector<16x8xbf16>, vector<16x8xbf16>, vector<16x8xbf16>, vector<16x8xbf16> -> vector<64x8xbf16>
    %37 = vector.shape_cast %36 : vector<64x8xbf16> to vector<4x16x8xbf16>
    %38 = arith.truncf %21 : vector<16x32xf32> to vector<16x32xbf16>
    %39 = vector.extract_strided_slice %38 {offsets = [0, 0], sizes = [16, 8], strides = [1, 1]} : vector<16x32xbf16> to vector<16x8xbf16>
    %40 = vector.extract_strided_slice %38 {offsets = [0, 8], sizes = [16, 8], strides = [1, 1]} : vector<16x32xbf16> to vector<16x8xbf16>
    %41 = vector.extract_strided_slice %38 {offsets = [0, 16], sizes = [16, 8], strides = [1, 1]} : vector<16x32xbf16> to vector<16x8xbf16>
    %42 = vector.extract_strided_slice %38 {offsets = [0, 24], sizes = [16, 8], strides = [1, 1]} : vector<16x32xbf16> to vector<16x8xbf16>
    %43 = tpu.concatenate %39, %40, %41, %42 in 0 : vector<16x8xbf16>, vector<16x8xbf16>, vector<16x8xbf16>, vector<16x8xbf16> -> vector<64x8xbf16>
    %44 = vector.shape_cast %43 : vector<64x8xbf16> to vector<4x16x8xbf16>
    "tpu.trace_start"() <{level = 10 : i32, message = "hld,hmd->hlm"}> : () -> ()
    %cst_19 = arith.constant dense<0.000000e+00> : vector<4x16x16xf32>
    %45 = tpu.matmul %30, %37, %cst_19 {dimension_numbers = #tpu.dot_dimension_numbers<[2], [2], [1], [1], [0, 0, 0, 1, 1, 1], [0], [0]>} : vector<4x16x8xbf16>, vector<4x16x8xbf16>, vector<4x16x16xf32> -> vector<4x16x16xf32>
    "tpu.trace_stop"() : () -> ()
    %46 = tpu.iota {dimensions = array<i32: 0>} : vector<16x16xi32>
    %47 = tpu.iota {dimensions = array<i32: 1>} : vector<16x16xi32>
    %c2_i32 = arith.constant 2 : i32
    %c0_i32 = arith.constant 0 : i32
    %48 = arith.cmpi eq, %c2_i32, %c0_i32 : i32
    %c1_i32 = arith.constant 1 : i32
    %49 = arith.select %48, %c1_i32, %c2_i32 : i32
    %50 = vector.broadcast %49 : i32 to vector<16x16xi32>
    %51 = arith.remsi %46, %50 : vector<16x16xi32>
    %c0_i32_20 = arith.constant 0 : i32
    %52 = vector.broadcast %c0_i32_20 : i32 to vector<16x16xi32>
    %53 = arith.cmpi ne, %51, %52 : vector<16x16xi32>
    %c0_i32_21 = arith.constant 0 : i32
    %54 = vector.broadcast %c0_i32_21 : i32 to vector<16x16xi32>
    %55 = arith.cmpi slt, %51, %54 : vector<16x16xi32>
    %c0_i32_22 = arith.constant 0 : i32
    %56 = arith.cmpi slt, %49, %c0_i32_22 : i32
    %57 = vector.broadcast %56 : i1 to vector<16x16xi1>
    %58 = vector.broadcast %57 : vector<16x16xi1> to vector<16x16xi1>
    %59 = arith.xori %55, %58 : vector<16x16xi1>
    %60 = arith.andi %59, %53 : vector<16x16xi1>
    %61 = vector.broadcast %49 : i32 to vector<16x16xi32>
    %62 = arith.addi %51, %61 : vector<16x16xi32>
    %63 = arith.select %60, %62, %51 : vector<16x16xi1>, vector<16x16xi32>
    %c2_i32_23 = arith.constant 2 : i32
    %c0_i32_24 = arith.constant 0 : i32
    %64 = arith.cmpi eq, %c2_i32_23, %c0_i32_24 : i32
    %c1_i32_25 = arith.constant 1 : i32
    %65 = arith.select %64, %c1_i32_25, %c2_i32_23 : i32
    %66 = vector.broadcast %65 : i32 to vector<16x16xi32>
    %67 = arith.remsi %47, %66 : vector<16x16xi32>
    %c0_i32_26 = arith.constant 0 : i32
    %68 = vector.broadcast %c0_i32_26 : i32 to vector<16x16xi32>
    %69 = arith.cmpi ne, %67, %68 : vector<16x16xi32>
    %c0_i32_27 = arith.constant 0 : i32
    %70 = vector.broadcast %c0_i32_27 : i32 to vector<16x16xi32>
    %71 = arith.cmpi slt, %67, %70 : vector<16x16xi32>
    %c0_i32_28 = arith.constant 0 : i32
    %72 = arith.cmpi slt, %65, %c0_i32_28 : i32
    %73 = vector.broadcast %72 : i1 to vector<16x16xi1>
    %74 = vector.broadcast %73 : vector<16x16xi1> to vector<16x16xi1>
    %75 = arith.xori %71, %74 : vector<16x16xi1>
    %76 = arith.andi %75, %69 : vector<16x16xi1>
    %77 = vector.broadcast %65 : i32 to vector<16x16xi32>
    %78 = arith.addi %67, %77 : vector<16x16xi32>
    %79 = arith.select %76, %78, %67 : vector<16x16xi1>, vector<16x16xi32>
    %80 = arith.cmpi eq, %63, %79 : vector<16x16xi32>
    %cst_29 = arith.constant -1.000000e+30 : f32
    %81 = vector.shape_cast %80 : vector<16x16xi1> to vector<1x16x16xi1>
    %82 = vector.broadcast %81 : vector<1x16x16xi1> to vector<4x16x16xi1>
    %83 = vector.broadcast %cst_29 : f32 to vector<4x16x16xf32>
    %84 = arith.select %82, %45, %83 : vector<4x16x16xi1>, vector<4x16x16xf32>
    %cst_30 = arith.constant dense<0xFF800000> : vector<4x16xf32>
    %85 = vector.multi_reduction <maximumf>, %84, %cst_30 [2] : vector<4x16x16xf32> to vector<4x16xf32>
    %86 = vector.shape_cast %85 : vector<4x16xf32> to vector<4x16x1xf32>
    %87 = vector.broadcast %86 : vector<4x16x1xf32> to vector<4x16x16xf32>
    %88 = arith.subf %84, %87 : vector<4x16x16xf32>
    %89 = math.exp %88 : vector<4x16x16xf32>
    %cst_31 = arith.constant dense<0.000000e+00> : vector<4x16xf32>
    %90 = vector.multi_reduction <add>, %89, %cst_31 [2] : vector<4x16x16xf32> to vector<4x16xf32>
    %91 = vector.shape_cast %90 : vector<4x16xf32> to vector<4x16x1xf32>
    %92 = vector.broadcast %91 : vector<4x16x1xf32> to vector<4x16x16xf32>
    %93 = arith.divf %89, %92 : vector<4x16x16xf32>
    %94 = arith.truncf %93 : vector<4x16x16xf32> to vector<4x16x16xbf16>
    "tpu.trace_start"() <{level = 10 : i32, message = "hlm,hmd->hld"}> : () -> ()
    %cst_32 = arith.constant dense<0.000000e+00> : vector<4x16x8xf32>
    %95 = tpu.matmul %94, %44, %cst_32 {dimension_numbers = #tpu.dot_dimension_numbers<[2], [1], [1], [2], [0, 0, 0, 1, 1, 2], [0], [0]>} : vector<4x16x16xbf16>, vector<4x16x8xbf16>, vector<4x16x8xf32> -> vector<4x16x8xf32>
    "tpu.trace_stop"() : () -> ()
    %96 = vector.shape_cast %95 : vector<4x16x8xf32> to vector<64x8xf32>
    %97 = vector.extract_strided_slice %96 {offsets = [0, 0], sizes = [16, 8], strides = [1, 1]} : vector<64x8xf32> to vector<16x8xf32>
    %98 = vector.extract_strided_slice %96 {offsets = [16, 0], sizes = [16, 8], strides = [1, 1]} : vector<64x8xf32> to vector<16x8xf32>
    %99 = vector.extract_strided_slice %96 {offsets = [32, 0], sizes = [16, 8], strides = [1, 1]} : vector<64x8xf32> to vector<16x8xf32>
    %100 = vector.extract_strided_slice %96 {offsets = [48, 0], sizes = [16, 8], strides = [1, 1]} : vector<64x8xf32> to vector<16x8xf32>
    %101 = tpu.concatenate %97, %98, %99, %100 in 1 : vector<16x8xf32>, vector<16x8xf32>, vector<16x8xf32>, vector<16x8xf32> -> vector<16x32xf32>
    %102 = arith.truncf %101 : vector<16x32xf32> to vector<16x32xbf16>
    %c0_33 = arith.constant 0 : index
    %c96 = arith.constant 96 : index
    %103 = vector.load %arg2[%c0_33, %c96] : memref<64x224xbf16, #tpu.memory_space<vmem>>, vector<32x32xbf16>
    %cst_34 = arith.constant dense<0.000000e+00> : vector<16x32xf32>
    %104 = tpu.matmul %102, %103, %cst_34 {dimension_numbers = #tpu.dot_dimension_numbers<[1], [0], [0], [1], [0, 0, 1, 1], [], []>} : vector<16x32xbf16>, vector<32x32xbf16>, vector<16x32xf32> -> vector<16x32xf32>
    %105 = vector.broadcast %5 : vector<1x32xf32> to vector<16x32xf32>
    %106 = arith.addf %104, %105 : vector<16x32xf32>
    %107 = arith.addf %0, %106 : vector<16x32xf32>
    %cst_35 = arith.constant dense<0.000000e+00> : vector<16xf32>
    %108 = vector.multi_reduction <add>, %107, %cst_35 [1] : vector<16x32xf32> to vector<16xf32>
    %109 = vector.shape_cast %108 : vector<16xf32> to vector<16x1xf32>
    %cst_36 = arith.constant 3.200000e+01 : f32
    %110 = vector.broadcast %cst_36 : f32 to vector<16x1xf32>
    %111 = arith.divf %109, %110 : vector<16x1xf32>
    %112 = vector.broadcast %111 : vector<16x1xf32> to vector<16x32xf32>
    %113 = arith.subf %107, %112 : vector<16x32xf32>
    %114 = arith.mulf %113, %113 : vector<16x32xf32>
    %cst_37 = arith.constant dense<0.000000e+00> : vector<16xf32>
    %115 = vector.multi_reduction <add>, %114, %cst_37 [1] : vector<16x32xf32> to vector<16xf32>
    %116 = vector.shape_cast %115 : vector<16xf32> to vector<16x1xf32>
    %cst_38 = arith.constant 3.200000e+01 : f32
    %117 = vector.broadcast %cst_38 : f32 to vector<16x1xf32>
    %118 = arith.divf %116, %117 : vector<16x1xf32>
    %119 = vector.broadcast %111 : vector<16x1xf32> to vector<16x32xf32>
    %120 = arith.subf %107, %119 : vector<16x32xf32>
    %cst_39 = arith.constant 9.99999974E-6 : f32
    %121 = vector.broadcast %cst_39 : f32 to vector<16x1xf32>
    %122 = arith.addf %118, %121 : vector<16x1xf32>
    %123 = math.rsqrt %122 : vector<16x1xf32>
    %124 = vector.broadcast %123 : vector<16x1xf32> to vector<16x32xf32>
    %125 = arith.mulf %120, %124 : vector<16x32xf32>
    %126 = vector.broadcast %7 : vector<1x32xf32> to vector<16x32xf32>
    %127 = arith.mulf %125, %126 : vector<16x32xf32>
    %128 = vector.broadcast %8 : vector<1x32xf32> to vector<16x32xf32>
    %129 = arith.addf %127, %128 : vector<16x32xf32>
    %130 = arith.truncf %129 : vector<16x32xf32> to vector<16x32xbf16>
    %c0_40 = arith.constant 0 : index
    %c128 = arith.constant 128 : index
    %131 = vector.load %arg2[%c0_40, %c128] : memref<64x224xbf16, #tpu.memory_space<vmem>>, vector<32x64xbf16>
    %cst_41 = arith.constant dense<0.000000e+00> : vector<16x64xf32>
    %132 = tpu.matmul %130, %131, %cst_41 {dimension_numbers = #tpu.dot_dimension_numbers<[1], [0], [0], [1], [0, 0, 1, 1], [], []>} : vector<16x32xbf16>, vector<32x64xbf16>, vector<16x64xf32> -> vector<16x64xf32>
    %133 = vector.broadcast %3 : vector<1x64xf32> to vector<16x64xf32>
    %134 = arith.addf %132, %133 : vector<16x64xf32>
    %cst_42 = arith.constant 0.000000e+00 : f32
    %135 = vector.broadcast %cst_42 : f32 to vector<16x64xf32>
    %136 = arith.maximumf %134, %135 : vector<16x64xf32>
    %137 = arith.truncf %136 : vector<16x64xf32> to vector<16x64xbf16>
    %c0_43 = arith.constant 0 : index
    %c192 = arith.constant 192 : index
    %138 = vector.load %arg2[%c0_43, %c192] : memref<64x224xbf16, #tpu.memory_space<vmem>>, vector<64x32xbf16>
    %cst_44 = arith.constant dense<0.000000e+00> : vector<16x32xf32>
    %139 = tpu.matmul %137, %138, %cst_44 {dimension_numbers = #tpu.dot_dimension_numbers<[1], [0], [0], [1], [0, 0, 1, 1], [], []>} : vector<16x64xbf16>, vector<64x32xbf16>, vector<16x32xf32> -> vector<16x32xf32>
    %140 = vector.broadcast %6 : vector<1x32xf32> to vector<16x32xf32>
    %141 = arith.addf %139, %140 : vector<16x32xf32>
    %142 = arith.addf %129, %141 : vector<16x32xf32>
    %cst_45 = arith.constant dense<0.000000e+00> : vector<16xf32>
    %143 = vector.multi_reduction <add>, %142, %cst_45 [1] : vector<16x32xf32> to vector<16xf32>
    %144 = vector.shape_cast %143 : vector<16xf32> to vector<16x1xf32>
    %cst_46 = arith.constant 3.200000e+01 : f32
    %145 = vector.broadcast %cst_46 : f32 to vector<16x1xf32>
    %146 = arith.divf %144, %145 : vector<16x1xf32>
    %147 = vector.broadcast %146 : vector<16x1xf32> to vector<16x32xf32>
    %148 = arith.subf %142, %147 : vector<16x32xf32>
    %149 = arith.mulf %148, %148 : vector<16x32xf32>
    %cst_47 = arith.constant dense<0.000000e+00> : vector<16xf32>
    %150 = vector.multi_reduction <add>, %149, %cst_47 [1] : vector<16x32xf32> to vector<16xf32>
    %151 = vector.shape_cast %150 : vector<16xf32> to vector<16x1xf32>
    %cst_48 = arith.constant 3.200000e+01 : f32
    %152 = vector.broadcast %cst_48 : f32 to vector<16x1xf32>
    %153 = arith.divf %151, %152 : vector<16x1xf32>
    %154 = vector.broadcast %146 : vector<16x1xf32> to vector<16x32xf32>
    %155 = arith.subf %142, %154 : vector<16x32xf32>
    %cst_49 = arith.constant 9.99999974E-6 : f32
    %156 = vector.broadcast %cst_49 : f32 to vector<16x1xf32>
    %157 = arith.addf %153, %156 : vector<16x1xf32>
    %158 = math.rsqrt %157 : vector<16x1xf32>
    %159 = vector.broadcast %158 : vector<16x1xf32> to vector<16x32xf32>
    %160 = arith.mulf %155, %159 : vector<16x32xf32>
    %161 = vector.broadcast %9 : vector<1x32xf32> to vector<16x32xf32>
    %162 = arith.mulf %160, %161 : vector<16x32xf32>
    %163 = vector.broadcast %10 : vector<1x32xf32> to vector<16x32xf32>
    %164 = arith.addf %162, %163 : vector<16x32xf32>
    %c0_50 = arith.constant 0 : index
    %c0_51 = arith.constant 0 : index
    %165 = vector.load %arg4[%c0_50, %c0_51] : memref<16x32xf32, #tpu.memory_space<vmem>>, vector<16x32xf32>
    tpu.vector_store %arg4[%c0_50, %c0_51], %164 {strides = array<i32>} : memref<16x32xf32, #tpu.memory_space<vmem>>, vector<16x32xf32>,
    return
  }
}

</mosaic_0001>

<bundles_post_ra>
// kernel: transformer_encoder_layer.1
= control target key start
LH: loop header
LB: loop body
LE: loop exit
PB: predicated region body
PF: predicated region fallthrough
CT: control target
= control target key end

     0   :  { %9 = vsyncpa [#allocation3], 0  ;;  %s1703_s0 = inlined_call_operand.hbm [shape: f32[16,32], index: 0, kind: input, shape index: {}]   ;;  %s1704_s1 = inlined_call_operand.hbm [shape: f32[16,32], index: 1, kind: input, shape index: {}]   ;;  %s1705_s2 = inlined_call_operand.hbm [shape: bf16[64,224], index: 2, kind: input, shape index: {}]   ;;  %s1706_s3 = inlined_call_operand.vmem [shape: f32[8,128], index: 3, kind: input, shape index: {}]   ;;  %s1707_s4 = inlined_call_operand.hbm [shape: f32[16,32], index: 4, kind: output, shape index: {}]  }
   0x1   :  { %10 = vsyncpa [#allocation6], 0 }
   0x2   :  { %11 = vsyncpa [#allocation4], 0  ;;  %s1420_s15 = smov [#allocation5]   ;;  %s1421_s17 = smov [#allocation2]  }
   0x3   :  { %s29_s16 = sshll.u32 %s1420_s15, 4  ;;  %s17_s18 = sshll.u32 %s1421_s17, 4  ;;  %s30_s16 = int_to_ptr.vmem [resolvable:$true] %s29_s16  ;;  %s1461_s18 = int_to_ptr.vmem [resolvable:$true] %s17_s18 }
   0x4   :  { %s1326_s21 = scalar_lea.hbm %s1704_s1, 256 }
   0x5   :  { %p1327_p0 = scmp.ne.s32.totalorder %s1704_s1, %s1326_s21  ;;  %p1330_p1 = scmp.lt.u32.totalorder %s1326_s21, %s1704_s1 }
   0x7   :  { %p1332_p2 = pnand %p1330_p1, %p1327_p0 }
   0x9   :  { %1335 = shalt.err (!%p1332_p2)
}
   0xa   :  { %s1336_s26 = scalar_lea.vmem %s30_s16, 256  ;;  %p1341_p4 = scmp.lt.s32.totalorder %s30_s16, %s30_s16 }
   0xb   :  { %p1337_p3 = scmp.ne.s32.totalorder %s30_s16, %s1336_s26  ;;  %p1342_p5 = scmp.lt.s32.totalorder %s1336_s26, %s1336_s26 }
   0xd   :  { %p1343_p6 = por %p1342_p5, %p1341_p4 }
   0xf   :  { %p1344_p7 = pnand %p1343_p6, %p1337_p3 }
  0x11   :  { %1347 = shalt.err (!%p1344_p7)
}
  0x12   :  { %s1422_s27 = smov 128   ;;  %s1423_s28 = smov 8  }
  0x13   :  { %35 = dma.hbm_to_vmem [thread:$0]  %s1704_s1, 256, %s30_s16, [#allocation6], %s1422_s27, %s1422_s27, %s1423_s28  }
  0x14   :  { %s1348_s7 = scalar_lea.hbm %s1703_s0, 256 }
  0x15   :  { %p1349_p8 = scmp.ne.s32.totalorder %s1703_s0, %s1348_s7  ;;  %p1352_p9 = scmp.lt.u32.totalorder %s1348_s7, %s1703_s0 }
  0x17   :  { %p1354_p10 = pnand %p1352_p9, %p1349_p8 }
  0x19   :  { %1357 = shalt.err (!%p1354_p10)
}
  0x1a   :  { %s1358_s12 = scalar_lea.vmem %s1461_s18, 256  ;;  %p1363_p12 = scmp.lt.s32.totalorder %s1461_s18, %s1461_s18 }
  0x1b   :  { %p1359_p11 = scmp.ne.s32.totalorder %s1461_s18, %s1358_s12  ;;  %p1364_p13 = scmp.lt.s32.totalorder %s1358_s12, %s1358_s12 }
  0x1d   :  { %p1365_p0 = por %p1364_p13, %p1363_p12 }
  0x1f   :  { %p1366_p1 = pnand %p1365_p0, %p1359_p11 }
  0x21   :  { %1369 = shalt.err (!%p1366_p1)
}
  0x22   :  { %23 = dma.hbm_to_vmem [thread:$0]  %s1703_s0, 256, %s1461_s18, [#allocation3], %s1422_s27, %s1422_s27, %s1423_s28  }
  0x23   :  { %s1424_s14 = smov [#allocation7]   ;;  %s1370_s19 = scalar_lea.hbm %s1705_s2, 1024 }
  0x24   :  { %s41_s15 = sshll.u32 %s1424_s14, 4  ;;  %p1371_p2 = scmp.ne.s32.totalorder %s1705_s2, %s1370_s19  ;;  %s42_s15 = int_to_ptr.vmem [resolvable:$true] %s41_s15 }
  0x25   :  { %p1374_p3 = scmp.lt.u32.totalorder %s1370_s19, %s1705_s2 }
  0x27   :  { %p1376_p4 = pnand %p1374_p3, %p1371_p2 }
  0x29   :  { %1379 = shalt.err (!%p1376_p4)
}
  0x2a   :  { %s1380_s24 = scalar_lea.vmem %s42_s15, 1024  ;;  %p1385_p6 = scmp.lt.s32.totalorder %s42_s15, %s42_s15 }
  0x2b   :  { %p1381_p5 = scmp.ne.s32.totalorder %s42_s15, %s1380_s24  ;;  %p1386_p7 = scmp.lt.s32.totalorder %s1380_s24, %s1380_s24 }
  0x2d   :  { %p1387_p8 = por %p1386_p7, %p1385_p6 }
  0x2f   :  { %p1388_p9 = pnand %p1387_p8, %p1381_p5 }
  0x31   :  { %1391 = shalt.err (!%p1388_p9)
}
  0x32   :  { %47 = dma.hbm_to_vmem [thread:$0]  %s1705_s2, 1024, %s42_s15, [#allocation6], %s1422_s27, %s1422_s27, %s1423_s28  }
  0x33   :  { %1414 = dma.done.wait [#allocation3], 256  }
  0x34   :  { %1415 = vsyncadd [#allocation3], 4294967040 }
  0x35   :  { %1416 = dma.done.wait [#allocation6], 1280  }
  0x36   :  { %1417 = vsyncadd [#allocation6], 4294966016  ;;  %v1425_v0 = vmov 0.0   ;;  %vm1426_vm0 = vmmov 0   ;;  %v1276_v1 = vld [vmem:[#allocation7] ss:$8 sps:$4 sm:$0xff]   ;;  %v409_v32 = vlaneseq }
  0x37   :  { %1153 = vmatprep.subr.bf16.mxu1 %v1425_v0  ;;  %1157 = vmatprep.mubr.msk.bf16.mxu1 %vm1426_vm0, %v1425_v0  ;;  %v1277_v2 = vld [vmem:[#allocation7 + $0x10] ss:$8 sps:$4 sm:$0xff]   ;;  %v1519_v3 = vld [vmem:[#allocation2] sm:$0xff]  ;;  %v1521_v4 = vld [vmem:[#allocation2 + $0x8] sm:$0xff]  ;;  %vm94_vm1 = vcmask 261120   ;;  %s1427_s26 = smov 104  }
  0x38   :  { %1169 = vmatprep.subr.bf16.mxu0 %v1425_v0  ;;  %1171 = vmatprep.mubr.msk.bf16.mxu0 %vm1426_vm0, %v1425_v0  ;;  %v62_v5 = vld [vmem:[#allocation5] sm:$0xff]  ;;  %v63_v6 = vld [vmem:[#allocation5 + $0x8] sm:$0xff]  ;;  %v1091_v10 = vld [vmem:[%s1706_s3] ss:$0 sm:$0xff]  ;;  %s1428_s29 = smov 120   ;;  %s1429_s30 = smov 64   ;;  %v73_v25 = vpack.c.bf16 %v1521_v4, %v1519_v3 }
  0x39   :  { %1154 = vmatpush3.bf16.msra.mxu1 %v1276_v1  ;;  %v70_v7 = vadd.f32 %v62_v5, %v1519_v3  ;;  %v71_v8 = vadd.f32 %v63_v6, %v1521_v4  ;;  %s1430_s5 = smov 112   ;;  %s1431_s6 = smov 96   ;;  %vm214_vm2 = vcmask 64512   ;;  %v410_v33 = vshrl.u32 %v409_v32, 7  ;;  %v1572_v38 = vld [vmem:[%s1706_s3 + $0x2] ss:$0 sm:$0xff] }
  0x3a   :  { %1155 = vmatprep.subr.bf16.mxu1 %v1425_v0  ;;  %v413_v34 = vand.u32 127, %v409_v32  ;;  %vm464_vm4 = vcmask 130048   ;;  %s1432_s9 = smov 32   ;;  %s1433_s10 = smov 16   ;;  %vm761_vm6 = vcmask 195584   ;;  %vm986_vm7 = vcmask 523264  }
  0x3b   :  { %v72_v9 = vpack.c.bf16 %v71_v8, %v70_v7  ;;  %v411_v35 = vadd.s32 8, %v410_v33  ;;  %v418_v36 = vand.u32 1, %v410_v33  ;;  %s1434_s11 = smov 24   ;;  %s1435_s20 = smov [#allocation8]  }
  0x3c   :  { %v442_v37 = vand.u32 1, %v413_v34  ;;  %s1078_s21 = sshll.u32 %s1435_s20, 4  ;;  %s1079_s21 = int_to_ptr.vmem [resolvable:$true] %s1078_s21 }
  0x3d   :  { %1156 = vmatpush3.bf16.msra.mxu1 %v1277_v2  ;;  %v425_v39 = vand.u32 1, %v411_v35  ;;  %p1397_p11 = scmp.lt.s32.totalorder %s1079_s21, %s1079_s21 }
  0x3e   :  { %1161 = vmatprep.subr.bf16.mxu1 %v1425_v0  ;;  %vm1575_vm3 = vcmp.eq.s32.totalorder %v418_v36, %v442_v37 }
  0x3f   :  { %vm1580_vm5 = vcmp.eq.s32.totalorder %v425_v39, %v442_v37 }
  0x40   :  { %1158 = vmatmul.mubr.msk.bf16.vlgmr.msra.gmra.mrb[0].mxu1 %vm94_vm1, %v72_v9 }
  0x41   :  { %1165 = vmatprep.mubr.msk.bf16.mxu1 %vm1426_vm0, %v1425_v0 }
 0x113   :  { %v132_v11 = vpop.f32.mrb[0].mxu1 }
 0x114   :  { %v1159_v12 = vpop.f32.mrb[1].mxu1  ;;  %v133_v14 = vadd.f32 %v1091_v10, %v132_v11 }
 0x115   :  { %v135_v13 = vpop.f32.mrb[2].mxu1 }
 0x116   :  { %v136_v15 = vadd.f32 %v1091_v10, %v135_v13  ;;  %v1160_v16 = vpop.f32.mrb[3].mxu1 }
 0x118   :  { %v193_v17 = vpack.c.bf16 %v136_v15, %v133_v14 }
 0x11a   :  { %199 = vrot.lane.b32.xlu1 %v193_v17, %s1427_s26  ;;  %195 = vrot.lane.b32.xlu0 %v193_v17, %s1428_s29 }
 0x11e   :  { %143 = vrot.lane.b32.xlu1 %v1276_v1, %s1429_s30  ;;  %197 = vrot.lane.b32.xlu0 %v193_v17, %s1430_s5 }
 0x122   :  { %212 = vrot.lane.b32.xlu1 %v193_v17, %s1431_s6  ;;  %145 = vrot.lane.b32.xlu0 %v1277_v2, %s1429_s30 }
 0x18c   :  { %v200_v18 = vpop.permute.xlu1 %199  ;;  %v196_v19 = vpop.permute.xlu0 %195 }
 0x18d   :  { %262 = vrot.lane.b32.xlu0 %v196_v19, %s1431_s6 }
 0x190   :  { %v144_v20 = vpop.permute.xlu1 %143  ;;  %v198_v21 = vpop.permute.xlu0 %197 }
 0x191   :  { %360 = vrot.lane.b32.xlu0 %v200_v18, %s1431_s6  ;;  %311 = vrot.lane.b32.xlu1 %v198_v21, %s1431_s6 }
 0x192   :  { %1162 = vmatpush3.bf16.msra.mxu1 %v144_v20 }
 0x193   :  { %1163 = vmatprep.subr.bf16.mxu1 %v1425_v0 }
 0x194   :  { %v213_v22 = vpop.permute.xlu1 %212  ;;  %v146_v23 = vpop.permute.xlu0 %145 }
 0x195   :  { %v219_v24 = vsel %vm214_vm2, %v213_v22, 0 }
 0x196   :  { %1170 = vmatpush3.bf16.xpose.msra.mxu0 %v219_v24  ;;  %1164 = vmatpush3.bf16.msra.mxu1 %v146_v23 }
 0x197   :  { %1175 = vmatprep.subr.bf16.mxu1 %v1425_v0  ;;  %1181 = vmatprep.subr.bf16.mxu0 %v1425_v0 }
 0x199   :  { %1166 = vmatmul.mubr.msk.bf16.vlgmr.msra.gmra.mrb[4].mxu1 %vm94_vm1, %v73_v25 }
 0x19a   :  { %1177 = vmatprep.mubr.msk.bf16.mxu1 %vm1426_vm0, %v1425_v0 }
 0x19d   :  { %1172 = vmatmul.mubr.msk.bf16.vlgmr.msra.gmra.mrb[0].mxu0 %vm214_vm2, %v193_v17 }
 0x19e   :  { %1183 = vmatprep.mubr.msk.bf16.mxu0 %vm1426_vm0, %v1425_v0 }
 0x1ff   :  { %v263_v26 = vpop.permute.xlu0 %262 }
 0x200   :  { %v268_v27 = vsel %vm214_vm2, %v263_v26, 0 }
 0x201   :  { %1176 = vmatpush3.bf16.xpose.msra.mxu1 %v268_v27 }
 0x202   :  { %1187 = vmatprep.subr.bf16.mxu1 %v1425_v0 }
 0x203   :  { %v312_v28 = vpop.permute.xlu1 %311  ;;  %v361_v30 = vpop.permute.xlu0 %360 }
 0x204   :  { %v317_v29 = vsel %vm214_vm2, %v312_v28, 0  ;;  %v366_v31 = vsel %vm214_vm2, %v361_v30, 0 }
 0x205   :  { %1182 = vmatpush3.bf16.xpose.msra.mxu0 %v317_v29 }
 0x206   :  { %1193 = vmatprep.subr.bf16.mxu0 %v1425_v0 }
 0x208   :  { %1178 = vmatmul.mubr.msk.bf16.vlgmr.msra.gmra.mrb[8].mxu1 %vm214_vm2, %v196_v19 }
 0x209   :  { %1188 = vmatpush3.bf16.xpose.msra.mxu1 %v366_v31  ;;  %1189 = vmatprep.mubr.msk.bf16.mxu1 %vm1426_vm0, %v1425_v0 }
 0x20a   :  { %1199 = vmatprep.subr.bf16.mxu1 %v1425_v0 }
 0x20c   :  { %1184 = vmatmul.mubr.msk.bf16.vlgmr.msra.gmra.mrb[4].mxu0 %vm214_vm2, %v198_v21 }
 0x20d   :  { %1195 = vmatprep.mubr.msk.bf16.mxu0 %vm1426_vm0, %v1425_v0 }
 0x210   :  { %1190 = vmatmul.mubr.msk.bf16.vlgmr.msra.gmra.mrb[12].mxu1 %vm214_vm2, %v200_v18 }
 0x211   :  { %1201 = vmatprep.mubr.msk.bf16.mxu1 %vm1426_vm0, %v1425_v0 }
 0x26c   :  { %v186_v40 = vpop.f32.mrb[4].mxu1 }
 0x26d   :  { %v187_v41 = vadd.f32 %v1572_v38, %v186_v40  ;;  %v1167_v42 = vpop.f32.mrb[5].mxu1 }
 0x26e   :  { %v189_v44 = vpop.f32.mrb[6].mxu1 }
 0x26f   :  { %v190_v45 = vadd.f32 %v1572_v38, %v189_v44  ;;  %v1168_v46 = vpop.f32.mrb[7].mxu1 }
 0x270   :  { %v255_v47 = vpop.f32.mrb[0].mxu0 }
 0x271   :  { %v456_v49 = vsel %vm1575_vm3, %v255_v47, -1e+30  ;;  %v1173_v50 = vpop.f32.mrb[1].mxu0  ;;  %v1586_v51 = vpack.c.bf16 %v190_v45, %v187_v41 }
 0x272   :  { %v258_v52 = vpop.f32.mrb[2].mxu0  ;;  %v465_v53 = vsel %vm464_vm4, %v456_v49, -inf }
 0x273   :  { %v457_v54 = vsel %vm1580_vm5, %v258_v52, -1e+30  ;;  %v1174_v55 = vpop.f32.mrb[3].mxu0  ;;  %466 = vmax.xlane.f32.xlu1 %v465_v53  ;;  %1194 = vmatpush3.bf16.msra.mxu0 %v1586_v51 }
 0x274   :  { %v468_v56 = vsel %vm464_vm4, %v457_v54, -inf  ;;  %1205 = vmatprep.subr.bf16.mxu0 %v1425_v0 }
 0x275   :  { %469 = vmax.xlane.f32.xlu0 %v468_v56 }
 0x2db   :  { %v304_v57 = vpop.f32.mrb[8].mxu1 }
 0x2dc   :  { %v458_v58 = vsel %vm1575_vm3, %v304_v57, -1e+30  ;;  %v1179_v59 = vpop.f32.mrb[9].mxu1 }
 0x2dd   :  { %v307_v60 = vpop.f32.mrb[10].mxu1  ;;  %v471_v61 = vsel %vm464_vm4, %v458_v58, -inf }
 0x2de   :  { %v459_v62 = vsel %vm1580_vm5, %v307_v60, -1e+30  ;;  %472 = vmax.xlane.f32.xlu0 %v471_v61  ;;  %v1180_v63 = vpop.f32.mrb[11].mxu1 }
 0x2df   :  { %v353_v1 = vpop.f32.mrb[4].mxu0  ;;  %v474_v2 = vsel %vm464_vm4, %v459_v62, -inf }
 0x2e0   :  { %v460_v5 = vsel %vm1575_vm3, %v353_v1, -1e+30  ;;  %v1185_v6 = vpop.f32.mrb[5].mxu0  ;;  %475 = vmax.xlane.f32.xlu1 %v474_v2 }
 0x2e1   :  { %v356_v7 = vpop.f32.mrb[6].mxu0  ;;  %v477_v8 = vsel %vm464_vm4, %v460_v5, -inf }
 0x2e2   :  { %v461_v9 = vsel %vm1580_vm5, %v356_v7, -1e+30  ;;  %v1186_v10 = vpop.f32.mrb[7].mxu0  ;;  %478 = vmax.xlane.f32.xlu0 %v477_v8 }
 0x2e3   :  { %v402_v11 = vpop.f32.mrb[12].mxu1  ;;  %v480_v12 = vsel %vm464_vm4, %v461_v9, -inf }
 0x2e4   :  { %v462_v13 = vsel %vm1575_vm3, %v402_v11, -1e+30  ;;  %481 = vmax.xlane.f32.xlu1 %v480_v12  ;;  %v1191_v14 = vpop.f32.mrb[13].mxu1 }
 0x2e5   :  { %v405_v15 = vpop.f32.mrb[14].mxu1  ;;  %v483_v16 = vsel %vm464_vm4, %v462_v13, -inf }
 0x2e6   :  { %v463_v17 = vsel %vm1580_vm5, %v405_v15, -1e+30  ;;  %484 = vmax.xlane.f32.xlu0 %v483_v16  ;;  %v1192_v18 = vpop.f32.mrb[15].mxu1 }
 0x2e7   :  { %v486_v19 = vsel %vm464_vm4, %v463_v17, -inf }
 0x2e8   :  { %487 = vmax.xlane.f32.xlu1 %v486_v19 }
 0x300   :  { %v467_v20 = vpop.xlane.xlu1 %466 }
 0x301   :  { %v489_v21 = vsub.f32 %v456_v49, %v467_v20 }
 0x302   :  { %v470_v22 = vpop.xlane.xlu0 %469 }
 0x303   :  { %v497_v23 = vmul.f32 1.442695, %v489_v21  ;;  %v490_v24 = vsub.f32 %v457_v54, %v470_v22 }
 0x305   :  { %1286 = vpow2.f32 %v497_v23  ;;  %v499_v25 = vmul.f32 1.442695, %v490_v24 }
 0x307   :  { %1288 = vpow2.f32 %v499_v25 }
 0x30f   :  { %v1287_v26 = vpop.eup %1286 }
 0x310   :  { %v513_v27 = vsel %vm464_vm4, %v1287_v26, 0.0 }
 0x311   :  { %v1289_v28 = vpop.eup %1288  ;;  %514 = vadd.xlane.f32.xlu0 %v513_v27 }
 0x312   :  { %v516_v29 = vsel %vm464_vm4, %v1289_v28, 0.0 }
 0x313   :  { %517 = vadd.xlane.f32.xlu1 %v516_v29 }
 0x36b   :  { %v473_v30 = vpop.xlane.xlu0 %472 }
 0x36c   :  { %v491_v31 = vsub.f32 %v458_v58, %v473_v30 }
 0x36d   :  { %v476_v32 = vpop.xlane.xlu1 %475 }
 0x36e   :  { %v501_v33 = vmul.f32 1.442695, %v491_v31  ;;  %v492_v34 = vsub.f32 %v459_v62, %v476_v32  ;;  %v1278_v31 = vld [vmem:[#allocation7] ss:$8 sps:$4 sm:$0xff]  }
 0x36f   :  { %v479_v35 = vpop.xlane.xlu0 %478 }
 0x370   :  { %1290 = vpow2.f32 %v501_v33  ;;  %v503_v36 = vmul.f32 1.442695, %v492_v34  ;;  %v493_v37 = vsub.f32 %v460_v5, %v479_v35 }
 0x371   :  { %v482_v39 = vpop.xlane.xlu1 %481 }
 0x372   :  { %1292 = vpow2.f32 %v503_v36  ;;  %v505_v40 = vmul.f32 1.442695, %v493_v37  ;;  %v494_v41 = vsub.f32 %v461_v9, %v482_v39 }
 0x373   :  { %v485_v42 = vpop.xlane.xlu0 %484 }
 0x374   :  { %1294 = vpow2.f32 %v505_v40  ;;  %v507_v43 = vmul.f32 1.442695, %v494_v41  ;;  %v495_v44 = vsub.f32 %v462_v13, %v485_v42 }
 0x375   :  { %v488_v57 = vpop.xlane.xlu1 %487 }
 0x376   :  { %1296 = vpow2.f32 %v507_v43  ;;  %v509_v45 = vmul.f32 1.442695, %v495_v44  ;;  %v496_v60 = vsub.f32 %v463_v17, %v488_v57 }
 0x378   :  { %1298 = vpow2.f32 %v509_v45  ;;  %v511_v61 = vmul.f32 1.442695, %v496_v60 }
 0x37a   :  { %v1291_v46 = vpop.eup %1290 }
 0x37b   :  { %v519_v47 = vsel %vm464_vm4, %v1291_v46, 0.0 }
 0x37c   :  { %v1293_v48 = vpop.eup %1292  ;;  %520 = vadd.xlane.f32.xlu0 %v519_v47 }
 0x37d   :  { %v522_v49 = vsel %vm464_vm4, %v1293_v48, 0.0 }
 0x37e   :  { %v1295_v50 = vpop.eup %1294  ;;  %523 = vadd.xlane.f32.xlu1 %v522_v49 }
 0x37f   :  { %v525_v52 = vsel %vm464_vm4, %v1295_v50, 0.0 }
 0x380   :  { %v1297_v53 = vpop.eup %1296  ;;  %526 = vadd.xlane.f32.xlu0 %v525_v52 }
 0x381   :  { %v528_v54 = vsel %vm464_vm4, %v1297_v53, 0.0 }
 0x382   :  { %v1299_v55 = vpop.eup %1298  ;;  %529 = vadd.xlane.f32.xlu1 %v528_v54 }
 0x383   :  { %v531_v56 = vsel %vm464_vm4, %v1299_v55, 0.0 }
 0x384   :  { %532 = vadd.xlane.f32.xlu0 %v531_v56 }
 0x393   :  { %206 = vrot.lane.b32.xlu1 %v1586_v51, %s1430_s5 }
 0x39a   :  { %203 = vrot.lane.b32.xlu0 %v1586_v51, %s1428_s29 }
 0x39e   :  { %v515_v58 = vpop.xlane.xlu0 %514  ;;  %779 = vrot.lane.b32.xlu0 %v1278_v31, %s1432_s9  ;;  %v1282_v31 = vld [vmem:[#allocation7 + $0x4] ss:$8 sps:$4 sm:$0xff]  }
 0x39f   :  { %1300 = vrcp.f32 %v515_v58 }
 0x3a0   :  { %v518_v59 = vpop.xlane.xlu1 %517 }
 0x3a1   :  { %1302 = vrcp.f32 %v518_v59 }
 0x3a2   :  { %1304 = vpow2.f32 %v511_v61 }
 0x3a9   :  { %v1301_v62 = vpop.eup %1300 }
 0x3aa   :  { %v538_v1 = vmul.f32 %v1301_v62, %v1287_v26 }
 0x3ab   :  { %v1303_v63 = vpop.eup %1302 }
 0x3ac   :  { %v540_v2 = vmul.f32 %v1303_v63, %v1289_v28  ;;  %v1305_v6 = vpop.eup %1304 }
 0x3ad   :  { %v534_v7 = vsel %vm464_vm4, %v1305_v6, 0.0 }
 0x3ae   :  { %v553_v5 = vpack.c.bf16 %v540_v2, %v538_v1 }
 0x3b0   :  { %1196 = vmatmul.mubr.msk.bf16.vlgmr.msra.gmra.mrb[8].mxu0 %vm464_vm4, %v553_v5 }
 0x3b1   :  { %1207 = vmatprep.mubr.msk.bf16.mxu0 %vm1426_vm0, %v1425_v0 }
 0x3b7   :  { %535 = vadd.xlane.f32.xlu1 %v534_v7 }
 0x3c8   :  { %209 = vrot.lane.b32.xlu1 %v1586_v51, %s1427_s26 }
 0x409   :  { %v521_v8 = vpop.xlane.xlu0 %520 }
 0x40a   :  { %1306 = vrcp.f32 %v521_v8 }
 0x40b   :  { %v524_v9 = vpop.xlane.xlu1 %523 }
 0x40c   :  { %1308 = vrcp.f32 %v524_v9 }
 0x40d   :  { %v527_v10 = vpop.xlane.xlu0 %526 }
 0x40e   :  { %1310 = vrcp.f32 %v527_v10 }
 0x40f   :  { %v530_v11 = vpop.xlane.xlu1 %529 }
 0x410   :  { %1312 = vrcp.f32 %v530_v11 }
 0x411   :  { %v533_v12 = vpop.xlane.xlu0 %532 }
 0x412   :  { %1314 = vrcp.f32 %v533_v12 }
 0x413   :  { %v207_v13 = vpop.permute.xlu1 %206 }
 0x414   :  { %v1307_v14 = vpop.eup %1306  ;;  %1206 = vmatpush3.bf16.msra.mxu0 %v207_v13 }
 0x415   :  { %v204_v15 = vpop.permute.xlu0 %203  ;;  %1217 = vmatprep.subr.bf16.mxu0 %v1425_v0  ;;  %v542_v17 = vmul.f32 %v1307_v14, %v1291_v46 }
 0x416   :  { %v1309_v16 = vpop.eup %1308  ;;  %1200 = vmatpush3.bf16.msra.mxu1 %v204_v15 }
 0x417   :  { %v544_v18 = vmul.f32 %v1309_v16, %v1293_v48  ;;  %1211 = vmatprep.subr.bf16.mxu1 %v1425_v0  ;;  %v1279_v48 = vld [vmem:[#allocation7 + $0x10] ss:$8 sps:$4 sm:$0xff]  }
 0x418   :  { %v1311_v51 = vpop.eup %1310 }
 0x419   :  { %v554_v19 = vpack.c.bf16 %v544_v18, %v542_v17  ;;  %v546_v21 = vmul.f32 %v1311_v51, %v1295_v50  ;;  %v780_v36 = vpop.permute.xlu0 %779 }
 0x41a   :  { %v1313_v20 = vpop.eup %1312 }
 0x41b   :  { %v548_v22 = vmul.f32 %v1313_v20, %v1297_v53  ;;  %1202 = vmatmul.mubr.msk.bf16.vlgmr.msra.gmra.mrb[16].mxu1 %vm464_vm4, %v554_v19  ;;  %v1108_v20 = vld [vmem:[%s1706_s3 + $0x4] ss:$0 sm:$0xff] }
 0x41c   :  { %1213 = vmatprep.mubr.msk.bf16.mxu1 %vm1426_vm0, %v1425_v0  ;;  %v1315_v26 = vpop.eup %1314 }
 0x41d   :  { %v555_v23 = vpack.c.bf16 %v548_v22, %v546_v21  ;;  %v550_v28 = vmul.f32 %v1315_v26, %v1299_v55 }
 0x41f   :  { %1208 = vmatmul.mubr.msk.bf16.vlgmr.msra.gmra.mrb[12].mxu0 %vm464_vm4, %v555_v23 }
 0x420   :  { %1221 = vmatprep.mubr.msk.bf16.mxu0 %vm1426_vm0, %v1425_v0  ;;  %1218 = vmatpush3.bf16.msra.mxu0 %v780_v36 }
 0x421   :  { %1219 = vmatprep.subr.bf16.mxu0 %v1425_v0 }
 0x444   :  { %v536_v24 = vpop.xlane.xlu1 %535 }
 0x445   :  { %1316 = vrcp.f32 %v536_v24 }
 0x448   :  { %v210_v25 = vpop.permute.xlu1 %209 }
 0x449   :  { %1212 = vmatpush3.bf16.msra.mxu1 %v210_v25 }
 0x44a   :  { %1225 = vmatprep.subr.bf16.mxu1 %v1425_v0 }
 0x44f   :  { %v1317_v27 = vpop.eup %1316 }
 0x450   :  { %v552_v29 = vmul.f32 %v1317_v27, %v1305_v6 }
 0x452   :  { %v556_v30 = vpack.c.bf16 %v552_v29, %v550_v28  ;;  %v1280_v29 = vld [vmem:[#allocation7 + $0x4] ss:$8 sps:$4 sm:$0xff]  }
 0x454   :  { %1214 = vmatmul.mubr.msk.bf16.vlgmr.msra.gmra.mrb[20].mxu1 %vm464_vm4, %v556_v30  ;;  %v1281_v30 = vld [vmem:[#allocation7 + $0x14] ss:$8 sps:$4 sm:$0xff]  }
 0x455   :  { %1229 = vmatprep.mubr.msk.bf16.mxu1 %vm1426_vm0, %v1425_v0  ;;  %1226 = vmatpush3.bf16.msra.mxu1 %v1280_v29 }
 0x456   :  { %1227 = vmatprep.subr.bf16.mxu1 %v1425_v0 }
 0x459   :  { %1228 = vmatpush3.bf16.msra.mxu1 %v1281_v30 }
 0x483   :  { %v594_v32 = vpop.f32.mrb[8].mxu0 }
 0x484   :  { %v1197_v33 = vpop.f32.mrb[9].mxu0 }
 0x485   :  { %v597_v34 = vpop.f32.mrb[10].mxu0  ;;  %v1284_v33 = vld [vmem:[#allocation7 + $0x24] ss:$8 sps:$4 sm:$0xff]  }
 0x486   :  { %v1198_v35 = vpop.f32.mrb[11].mxu0 }
 0x4ee   :  { %v638_v37 = vpop.f32.mrb[16].mxu1 }
 0x4ef   :  { %v1203_v39 = vpop.f32.mrb[17].mxu1 }
 0x4f0   :  { %v641_v40 = vpop.f32.mrb[18].mxu1 }
 0x4f1   :  { %v1261_v41 = vpack.i.bf16 %v641_v40, %v638_v37  ;;  %v1204_v42 = vpop.f32.mrb[19].mxu1 }
 0x4f2   :  { %v682_v43 = vpop.f32.mrb[12].mxu0 }
 0x4f3   :  { %v1209_v44 = vpop.f32.mrb[13].mxu0  ;;  %1262 = vrot.lane.b32.xlu1 %v1261_v41, %s1423_s28 }
 0x4f4   :  { %v685_v45 = vpop.f32.mrb[14].mxu0 }
 0x4f5   :  { %v1266_v46 = vpack.i.bf16 %v685_v45, %v682_v43  ;;  %v1210_v47 = vpop.f32.mrb[15].mxu0 }
 0x4f7   :  { %1267 = vrot.lane.b32.xlu0 %v1266_v46, %s1433_s10 }
 0x4fb   :  { %781 = vrot.lane.b32.xlu0 %v1279_v48, %s1432_s9 }
 0x527   :  { %v726_v49 = vpop.f32.mrb[20].mxu1 }
 0x528   :  { %v1215_v50 = vpop.f32.mrb[21].mxu1 }
 0x529   :  { %v729_v52 = vpop.f32.mrb[22].mxu1 }
 0x52a   :  { %v1271_v53 = vpack.i.bf16 %v729_v52, %v726_v49  ;;  %v1216_v54 = vpop.f32.mrb[23].mxu1 }
 0x52c   :  { %1272 = vrot.lane.b32.xlu1 %v1271_v53, %s1434_s11 }
 0x530   :  { %786 = vrot.lane.b32.xlu1 %v1572_v38, %s1431_s6 }
 0x565   :  { %v1263_v57 = vpop.permute.xlu1 %1262 }
 0x566   :  { %v1265_v58 = vunpack.i.h.bf16 %v1263_v57  ;;  %v1264_v59 = vunpack.i.l.bf16 %v1263_v57  ;;  %v1109_v57 = vld [vmem:[%s1706_s3 + $0x1] ss:$0 sm:$0xff] }
 0x568   :  { %v758_v63 = vsel %vm214_vm2, %v597_v34, %v1265_v58  ;;  %v757_v1 = vsel %vm214_vm2, %v594_v32, %v1264_v59  ;;  %v1283_v32 = vld [vmem:[#allocation7 + $0x14] ss:$8 sps:$4 sm:$0xff]  }
 0x569   :  { %v1268_v55 = vpop.permute.xlu0 %1267  ;;  %v1285_v34 = vld [vmem:[#allocation7 + $0x34] ss:$8 sps:$4 sm:$0xff]  }
 0x56a   :  { %v1270_v60 = vunpack.i.h.bf16 %v1268_v55  ;;  %v1269_v61 = vunpack.i.l.bf16 %v1268_v55 }
 0x56c   :  { %v759_v38 = vsel %vm464_vm4, %v757_v1, %v1269_v61  ;;  %v760_v6 = vsel %vm464_vm4, %v758_v63, %v1270_v60 }
 0x56d   :  { %v782_v56 = vpop.permute.xlu0 %781 }
 0x56e   :  { %1220 = vmatpush3.bf16.msra.mxu0 %v782_v56 }
 0x56f   :  { %1233 = vmatprep.subr.bf16.mxu0 %v1425_v0 }
 0x59e   :  { %v1273_v62 = vpop.permute.xlu1 %1272 }
 0x59f   :  { %v1275_v2 = vunpack.i.h.bf16 %v1273_v62  ;;  %v1274_v5 = vunpack.i.l.bf16 %v1273_v62 }
 0x5a1   :  { %v763_v7 = vsel %vm761_vm6, %v760_v6, %v1275_v2  ;;  %v762_v8 = vsel %vm761_vm6, %v759_v38, %v1274_v5 }
 0x5a2   :  { %v764_v9 = vpack.c.bf16 %v763_v7, %v762_v8  ;;  %v787_v10 = vpop.permute.xlu1 %786 }
 0x5a4   :  { %1222 = vmatmul.mubr.msk.bf16.vlgmr.msra.gmra.mrb[16].mxu0 %vm94_vm1, %v764_v9 }
 0x5a5   :  { %1241 = vmatprep.mubr.msk.bf16.mxu0 %vm1426_vm0, %v1425_v0 }
 0x677   :  { %v826_v11 = vpop.f32.mrb[16].mxu0 }
 0x678   :  { %v827_v12 = vadd.f32 %v826_v11, %v787_v10  ;;  %v1223_v13 = vpop.f32.mrb[17].mxu0 }
 0x679   :  { %v829_v14 = vpop.f32.mrb[18].mxu0 }
 0x67a   :  { %v830_v15 = vadd.f32 %v829_v14, %v787_v10  ;;  %v1224_v16 = vpop.f32.mrb[19].mxu0  ;;  %v833_v17 = vadd.f32 %v827_v12, %v1519_v3 }
 0x67c   :  { %v835_v18 = vsel %vm94_vm1, %v833_v17, 0.0  ;;  %v834_v51 = vadd.f32 %v830_v15, %v1521_v4 }
 0x67d   :  { %836 = vadd.xlane.f32.xlu0 %v835_v18 }
 0x67e   :  { %v838_v19 = vsel %vm94_vm1, %v834_v51, 0.0 }
 0x67f   :  { %839 = vadd.xlane.f32.xlu1 %v838_v19 }
 0x690   :  { %869 = vrot.lane.b32.xlu1 %v1108_v20, %s1431_s6 }
 0x694   :  { %976 = vrot.lane.b32.xlu1 %v1283_v32, %s1429_s30 }
 0x698   :  { %978 = vrot.lane.b32.xlu1 %v1284_v33, %s1429_s30 }
 0x70a   :  { %v837_v21 = vpop.xlane.xlu0 %836 }
 0x70b   :  { %v842_v22 = vmul.f32 0.03125, %v837_v21 }
 0x70c   :  { %v840_v23 = vpop.xlane.xlu1 %839 }
 0x70d   :  { %v844_v24 = vsub.f32 %v833_v17, %v842_v22  ;;  %v843_v25 = vmul.f32 0.03125, %v840_v23 }
 0x70f   :  { %v845_v3 = vsub.f32 %v834_v51, %v843_v25  ;;  %v846_v26 = vmul.f32 %v844_v24, %v844_v24 }
 0x710   :  { %v870_v42 = vpop.permute.xlu1 %869 }
 0x711   :  { %v848_v27 = vsel %vm94_vm1, %v846_v26, 0.0  ;;  %v847_v4 = vmul.f32 %v845_v3, %v845_v3 }
 0x712   :  { %849 = vadd.xlane.f32.xlu0 %v848_v27 }
 0x713   :  { %v851_v28 = vsel %vm94_vm1, %v847_v4, 0.0 }
 0x714   :  { %v977_v46 = vpop.permute.xlu1 %976 }
 0x716   :  { %852 = vadd.xlane.f32.xlu0 %v851_v28 }
 0x718   :  { %v979_v55 = vpop.permute.xlu1 %978 }
 0x72c   :  { %974 = vrot.lane.b32.xlu0 %v1282_v31, %s1429_s30 }
 0x730   :  { %980 = vrot.lane.b32.xlu0 %v1285_v34, %s1429_s30 }
 0x79f   :  { %v850_v35 = vpop.xlane.xlu0 %849 }
 0x7a0   :  { %v854_v36 = vmul.f32 0.03125, %v850_v35 }
 0x7a2   :  { %v856_v37 = vadd.f32 1e-05, %v854_v36 }
 0x7a3   :  { %v853_v39 = vpop.xlane.xlu0 %852 }
 0x7a4   :  { %1318 = vrsqrt.f32 %v856_v37  ;;  %v855_v40 = vmul.f32 0.03125, %v853_v39 }
 0x7a6   :  { %v857_v41 = vadd.f32 1e-05, %v855_v40 }
 0x7a7   :  { %v975_v45 = vpop.permute.xlu0 %974 }
 0x7a8   :  { %1320 = vrsqrt.f32 %v857_v41  ;;  %1234 = vmatpush3.bf16.msra.mxu0 %v975_v45 }
 0x7a9   :  { %1235 = vmatprep.subr.bf16.mxu0 %v1425_v0 }
 0x7ab   :  { %v981_v56 = vpop.permute.xlu0 %980 }
 0x7ac   :  { %1236 = vmatpush3.bf16.msra.mxu0 %v977_v46 }
 0x7ad   :  { %1237 = vmatprep.subr.bf16.mxu0 %v1425_v0 }
 0x7ae   :  { %v1319_v43 = vpop.eup %1318 }
 0x7af   :  { %v860_v44 = vmul.f32 %v1319_v43, %v844_v24  ;;  %v1119_v24 = vld [vmem:[%s1706_s3 + $0x5] ss:$0 sm:$0xff] }
 0x7b0   :  { %1238 = vmatpush3.bf16.msra.mxu0 %v979_v55 }
 0x7b1   :  { %v866_v49 = vmul.f32 %v1108_v20, %v860_v44  ;;  %1239 = vmatprep.subr.bf16.mxu0 %v1425_v0  ;;  %v1113_v0 = vld [vmem:[%s1706_s3 + $0x3] ss:$0 sm:$0xff]  ;;  %s1392_s3 = scalar_lea.vmem %s1079_s21, 256 }
 0x7b2   :  { %v1321_v47 = vpop.eup %1320  ;;  %p1393_p10 = scmp.ne.s32.totalorder %s1079_s21, %s1392_s3  ;;  %p1398_p12 = scmp.lt.s32.totalorder %s1392_s3, %s1392_s3 }
 0x7b3   :  { %v861_v48 = vmul.f32 %v1321_v47, %v845_v3  ;;  %v872_v52 = vadd.f32 %v870_v42, %v866_v49 }
 0x7b4   :  { %1240 = vmatpush3.bf16.msra.mxu0 %v981_v56  ;;  %p1399_p13 = por %p1398_p12, %p1397_p11 }
 0x7b5   :  { %v867_v50 = vmul.f32 %v1108_v20, %v861_v48 }
 0x7b6   :  { %p1400_p0 = pnand %p1399_p13, %p1393_p10 }
 0x7b7   :  { %v873_v53 = vadd.f32 %v870_v42, %v867_v50 }
 0x7b9   :  { %v874_v54 = vpack.c.bf16 %v873_v53, %v872_v52 }
 0x7bb   :  { %1230 = vmatmul.mubr.msk.bf16.vlgmr.msra.gmra.mrb[24].mxu1 %vm94_vm1, %v874_v54 }
 0x88e   :  { %v932_v58 = vpop.f32.mrb[24].mxu1 }
 0x88f   :  { %v933_v59 = vadd.f32 %v1109_v57, %v932_v58  ;;  %v1231_v60 = vpop.f32.mrb[25].mxu1 }
 0x890   :  { %v935_v61 = vpop.f32.mrb[26].mxu1 }
 0x891   :  { %v936_v62 = vadd.f32 %v1109_v57, %v935_v61  ;;  %v1232_v63 = vpop.f32.mrb[27].mxu1  ;;  %v939_v1 = vmax.f32 %v933_v59, 0.0 }
 0x893   :  { %v940_v2 = vmax.f32 %v936_v62, 0.0 }
 0x895   :  { %v941_v5 = vpack.c.bf16 %v940_v2, %v939_v1 }
 0x897   :  { %1242 = vmatmul.mubr.msk.bf16.vlgmr.msra.gmra.mrb[20].mxu0 %vm986_vm7, %v941_v5 }
 0x96a   :  { %v1024_v38 = vpop.f32.mrb[20].mxu0 }
 0x96b   :  { %v1025_v6 = vadd.f32 %v1113_v0, %v1024_v38  ;;  %v1243_v7 = vpop.f32.mrb[21].mxu0 }
 0x96c   :  { %v1027_v8 = vpop.f32.mrb[22].mxu0 }
 0x96d   :  { %v1028_v9 = vadd.f32 %v1113_v0, %v1027_v8  ;;  %v1244_v10 = vpop.f32.mrb[23].mxu0  ;;  %v1031_v11 = vadd.f32 %v1025_v6, %v872_v52 }
 0x96f   :  { %v1033_v12 = vsel %vm94_vm1, %v1031_v11, 0.0  ;;  %v1032_v13 = vadd.f32 %v1028_v9, %v873_v53 }
 0x970   :  { %1034 = vadd.xlane.f32.xlu1 %v1033_v12 }
 0x971   :  { %v1036_v14 = vsel %vm94_vm1, %v1032_v13, 0.0 }
 0x972   :  { %1037 = vadd.xlane.f32.xlu0 %v1036_v14 }
 0x9fd   :  { %v1035_v15 = vpop.xlane.xlu1 %1034 }
 0x9fe   :  { %v1039_v16 = vmul.f32 0.03125, %v1035_v15 }
 0x9ff   :  { %v1038_v17 = vpop.xlane.xlu0 %1037 }
 0xa00   :  { %v1041_v18 = vsub.f32 %v1031_v11, %v1039_v16  ;;  %v1040_v51 = vmul.f32 0.03125, %v1038_v17 }
 0xa02   :  { %v1042_v19 = vsub.f32 %v1032_v13, %v1040_v51  ;;  %v1043_v20 = vmul.f32 %v1041_v18, %v1041_v18 }
 0xa04   :  { %v1045_v21 = vsel %vm94_vm1, %v1043_v20, 0.0  ;;  %v1044_v22 = vmul.f32 %v1042_v19, %v1042_v19 }
 0xa05   :  { %1046 = vadd.xlane.f32.xlu0 %v1045_v21 }
 0xa06   :  { %v1048_v23 = vsel %vm94_vm1, %v1044_v22, 0.0 }
 0xa07   :  { %1049 = vadd.xlane.f32.xlu1 %v1048_v23 }
 0xa1b   :  { %1066 = vrot.lane.b32.xlu0 %v1119_v24, %s1431_s6 }
 0xa92   :  { %v1047_v25 = vpop.xlane.xlu0 %1046 }
 0xa93   :  { %v1051_v3 = vmul.f32 0.03125, %v1047_v25 }
 0xa94   :  { %v1050_v26 = vpop.xlane.xlu1 %1049 }
 0xa95   :  { %v1053_v27 = vadd.f32 1e-05, %v1051_v3  ;;  %v1052_v4 = vmul.f32 0.03125, %v1050_v26 }
 0xa96   :  { %v1067_v32 = vpop.permute.xlu0 %1066 }
 0xa97   :  { %1322 = vrsqrt.f32 %v1053_v27  ;;  %v1054_v28 = vadd.f32 1e-05, %v1052_v4 }
 0xa99   :  { %1324 = vrsqrt.f32 %v1054_v28 }
 0xaa1   :  { %v1323_v29 = vpop.eup %1322 }
 0xaa2   :  { %v1057_v30 = vmul.f32 %v1323_v29, %v1041_v18 }
 0xaa3   :  { %v1325_v31 = vpop.eup %1324 }
 0xaa4   :  { %v1058_v33 = vmul.f32 %v1325_v31, %v1042_v19  ;;  %v1063_v34 = vmul.f32 %v1119_v24, %v1057_v30 }
 0xaa6   :  { %v1064_v35 = vmul.f32 %v1119_v24, %v1058_v33  ;;  %v1069_v36 = vadd.f32 %v1067_v32, %v1063_v34 }
 0xaa8   :  { %v1070_v37 = vadd.f32 %v1067_v32, %v1064_v35  ;;  %1071 = vst.msk [vmem:[#allocation8] sm:$0xff] %vm94_vm1, %v1069_v36 }
 0xaaa   :  { %1072 = vst.msk [vmem:[#allocation8 + $0x8] sm:$0xff] %vm94_vm1, %v1070_v37 }
 0xaab   :  { %1403 = shalt.err (!%p1400_p0)
}
 0xaac   :  { %s1404_s24 = scalar_lea.hbm %s1707_s4, 256 }
 0xaad   :  { %p1405_p1 = scmp.ne.s32.totalorder %s1707_s4, %s1404_s24  ;;  %p1408_p2 = scmp.lt.u32.totalorder %s1404_s24, %s1707_s4 }
 0xaaf   :  { %p1410_p3 = pnand %p1408_p2, %p1405_p1 }
 0xab1   :  { %1413 = shalt.err (!%p1410_p3)
}
 0xab2   :  { %1084 = dma.vmem_to_hbm [thread:$0]  %s1079_s21, 256, %s1707_s4, [#allocation4], %s1422_s27, %s1422_s27, %s1423_s28  }
 0xab3   :  { %1418 = dma.done.wait [#allocation4], 256  }
 0xab4   :  { %1419 = vsyncadd [#allocation4], 4294967040 }
 0xab5   :  { %1088 = vsyncpa [#allocation3], 1 }
 0xab6   :  { %1089 = vsyncpa [#allocation6], 1 }
 0xab7   :  { %1090 = vsyncpa [#allocation4], 1 }

</bundles_post_ra>
